<compile_context>
chip_gen: v6e
topology: v6e:2x2x1
jax: 0.10.0
libtpu: 0.0.40
codegen_flags: <defaults>
</compile_context>

<pallas_src>
import functools

import jax
import jax.numpy as jnp
from jax.experimental import pallas as pl
from jax.experimental.pallas import tpu as pltpu


def _senet_kernel(x_ref, w1t_ref, w2t_ref, o_ref, *, inv_hw):
    # x_ref: (TB, C, HW)   w1t_ref: (C, Cr)   w2t_ref: (Cr, C)
    # Squeeze: spatial mean accumulated in f32 without materializing a full
    # f32 copy of the tile (keeps VMEM/vreg pressure low as tiles grow).
    pooled = jnp.sum(x_ref[...], axis=2, dtype=jnp.float32) * inv_hw       # (TB, C)
    # Excitation: two tiny fc matmuls (M=TB rows on the MXU), sigmoid on EUP.
    h = jnp.dot(pooled, w1t_ref[...].astype(jnp.float32),
                preferred_element_type=jnp.float32)                         # (TB, Cr)
    s = jnp.dot(h, w2t_ref[...].astype(jnp.float32),
                preferred_element_type=jnp.float32)                         # (TB, C)
    gate = jax.nn.sigmoid(s).astype(o_ref.dtype)                            # (TB, C)
    # Scale: re-read the tile (cheap vld) rather than keeping it live across
    # the squeeze -> fc -> sigmoid dependency chain.
    o_ref[...] = (x_ref[...] * gate[:, :, None]).astype(o_ref.dtype)


def _vmem_capacity_bytes():
    try:
        return int(pltpu.get_tpu_info().vmem_capacity_bytes)
    except Exception:  # pragma: no cover - conservative fallback (v7x size)
        return 64 << 20


def _choose_batch_tile(batch, per_batch_bytes, budget_bytes):
    """Pick a batch tile TB for a cdiv grid.

    Priorities: tile bytes <= budget; grid length even and >= 2 (v7x has two
    TensorCores sharded via dimension_semantics=('parallel',)); TB a multiple
    of 8 when that doesn't change the grid.
    """
    cdiv = lambda a, b: -(-a // b)
    if batch <= 1:
        return 1
    tb_max = max(1, min(batch, budget_bytes // max(per_batch_bytes, 1)))
    grid = cdiv(batch, tb_max)
    if grid < 2:
        grid = 2
    if grid % 2:
        grid += 1
    tb = max(1, cdiv(batch, grid))
    # Sublane-align TB if it keeps the same grid and stays within budget.
    if tb >= 8:
        tb8 = ((tb + 7) // 8) * 8
        if cdiv(batch, tb8) == grid and tb8 <= tb_max:
            tb = tb8
    return tb


def senet_forward(x_nchw, w1, w2):
    """SENet forward.

    x_nchw: (B, C, H, W)
    w1:     (C//r, C)   -- PyTorch fc1.weight layout (no bias)
    w2:     (C, C//r)   -- PyTorch fc2.weight layout (no bias)
    """
    B, C, H, W = x_nchw.shape
    HW = H * W
    itemsize = jnp.dtype(x_nchw.dtype).itemsize

    # No padding / post-slice: last-dim block equals the full HW extent.
    x_flat = x_nchw.reshape(B, C, HW)

    w1t = w1.T  # (C, Cr)
    w2t = w2.T  # (Cr, C)
    Cr = w1t.shape[1]
    weight_bytes = (w1t.size + w2t.size) * jnp.dtype(w1t.dtype).itemsize

    # Generation-aware VMEM budgeting (v7x: 64 MiB/core, v5e/v6e: 128 MiB).
    vmem_budget = int(_vmem_capacity_bytes() * 0.70)
    per_batch_bytes = C * HW * itemsize
    # Footprint ~= 4*tile (in+out tiles, double-buffered) + ~2*tile temporaries.
    tile_budget = (vmem_budget - 2 * weight_bytes - (2 << 20)) // 6
    tile_budget = max(1 << 20, min(8 << 20, tile_budget))

    TB = _choose_batch_tile(B, per_batch_bytes, tile_budget)
    grid = (pl.cdiv(B, TB),)

    tile_bytes = TB * per_batch_bytes
    vmem_needed = 6 * tile_bytes + 2 * weight_bytes + (2 << 20)
    vmem_limit = int(min(max(vmem_needed, 16 << 20), vmem_budget))

    cost = pl.CostEstimate(
        flops=int(B * (2 * C * HW + 4 * C * Cr)),
        transcendentals=int(B * C),
        bytes_accessed=int(2 * B * C * HW * itemsize + weight_bytes),
    )

    kernel = functools.partial(_senet_kernel, inv_hw=1.0 / float(HW))

    out = pl.pallas_call(
        kernel,
        out_shape=jax.ShapeDtypeStruct((B, C, HW), x_nchw.dtype),
        grid_spec=pltpu.PrefetchScalarGridSpec(
            num_scalar_prefetch=0,
            grid=grid,
            in_specs=[
                pl.BlockSpec((TB, C, HW), lambda b: (b, 0, 0)),
                pl.BlockSpec((C, Cr), lambda b: (0, 0)),
                pl.BlockSpec((Cr, C), lambda b: (0, 0)),
            ],
            out_specs=pl.BlockSpec((TB, C, HW), lambda b: (b, 0, 0)),
        ),
        compiler_params=pltpu.CompilerParams(
            dimension_semantics=("parallel",),
            vmem_limit_bytes=vmem_limit,
        ),
        cost_estimate=cost,
    )(x_flat, w1t, w2t)

    return out.reshape(B, C, H, W)


def senet_reference(x, w1, w2):
    pooled = jnp.mean(x, axis=(2, 3))              # (B, C)
    s = (pooled @ w1.T) @ w2.T                     # (B, C)
    return x * jax.nn.sigmoid(s)[:, :, None, None]


if __name__ == "__main__":
    B, C, H, W = 4, 64, 16, 16
    reduction = 16
    Cr = C // reduction  # 4

    key = jax.random.PRNGKey(0)
    kx, k1, k2 = jax.random.split(key, 3)
    x = jax.random.normal(kx, (B, C, H, W), dtype=jnp.float32)
    # PyTorch Linear weights: fc1.weight (C//r, C), fc2.weight (C, C//r)
    w1 = jax.random.normal(k1, (Cr, C), dtype=jnp.float32) * 0.1
    w2 = jax.random.normal(k2, (C, Cr), dtype=jnp.float32) * 0.1

    out = senet_forward(x, w1, w2)
    jax.block_until_ready(out)

    ref = senet_reference(x, w1, w2)
    assert jnp.allclose(out, ref, atol=1e-5, rtol=1e-5), "mismatch vs reference"

    print("KERNEL_OK")
</pallas_src>

<mosaic_0001>
module attributes {stable_mosaic.version = 11 : i64} {
  func.func @_senet_kernel(%arg0: i32, %arg1: memref<2x64x256xf32, #tpu.memory_space<vmem>>, %arg2: memref<64x4xf32, #tpu.memory_space<vmem>>, %arg3: memref<4x64xf32, #tpu.memory_space<vmem>>, %arg4: memref<2x64x256xf32, #tpu.memory_space<vmem>>) attributes {dimension_semantics = [#tpu.dimension_semantics<parallel>], iteration_bounds = array<i64: 2>, scalar_prefetch = 0 : i64, scratch_operands = 0 : i64, tpu.core_type = #tpu.core_type<tc>, window_params = [{transform_indices = @transform_0, window_bounds = array<i64: 2, 64, 256>}, {pipeline_mode = #tpu.pipeline_mode<synchronous>, transform_indices = @transform_1, window_bounds = array<i64: 64, 4>}, {pipeline_mode = #tpu.pipeline_mode<synchronous>, transform_indices = @transform_2, window_bounds = array<i64: 4, 64>}, {transform_indices = @transform_3, window_bounds = array<i64: 2, 64, 256>}]} {
    %c0 = arith.constant 0 : index
    %c0_0 = arith.constant 0 : index
    %c0_1 = arith.constant 0 : index
    %0 = vector.load %arg1[%c0, %c0_0, %c0_1] : memref<2x64x256xf32, #tpu.memory_space<vmem>>, vector<2x64x256xf32>
    %cst = arith.constant dense<0.000000e+00> : vector<2x64xf32>
    %1 = vector.multi_reduction <add>, %0, %cst [2] : vector<2x64x256xf32> to vector<2x64xf32>
    %cst_2 = arith.constant 3.906250e-03 : f32
    %2 = vector.broadcast %cst_2 : f32 to vector<2x64xf32>
    %3 = arith.mulf %1, %2 : vector<2x64xf32>
    %c0_3 = arith.constant 0 : index
    %c0_4 = arith.constant 0 : index
    %4 = vector.load %arg2[%c0_3, %c0_4] : memref<64x4xf32, #tpu.memory_space<vmem>>, vector<64x4xf32>
    %cst_5 = arith.constant dense<0.000000e+00> : vector<2x4xf32>
    %5 = tpu.matmul %3, %4, %cst_5 {dimension_numbers = #tpu.dot_dimension_numbers<[1], [0], [0], [1], [0, 0, 1, 1], [], []>} : vector<2x64xf32>, vector<64x4xf32>, vector<2x4xf32> -> vector<2x4xf32>
    %c0_6 = arith.constant 0 : index
    %c0_7 = arith.constant 0 : index
    %6 = vector.load %arg3[%c0_6, %c0_7] : memref<4x64xf32, #tpu.memory_space<vmem>>, vector<4x64xf32>
    %cst_8 = arith.constant dense<0.000000e+00> : vector<2x64xf32>
    %7 = tpu.matmul %5, %6, %cst_8 {dimension_numbers = #tpu.dot_dimension_numbers<[1], [0], [0], [1], [0, 0, 1, 1], [], []>} : vector<2x4xf32>, vector<4x64xf32>, vector<2x64xf32> -> vector<2x64xf32>
    %8 = arith.negf %7 : vector<2x64xf32>
    %9 = math.exp %8 : vector<2x64xf32>
    %cst_9 = arith.constant 1.000000e+00 : f32
    %10 = vector.broadcast %cst_9 : f32 to vector<2x64xf32>
    %11 = arith.addf %10, %9 : vector<2x64xf32>
    %12 = arith.divf %10, %11 : vector<2x64xf32>
    %c0_10 = arith.constant 0 : index
    %c0_11 = arith.constant 0 : index
    %c0_12 = arith.constant 0 : index
    %13 = vector.load %arg1[%c0_10, %c0_11, %c0_12] : memref<2x64x256xf32, #tpu.memory_space<vmem>>, vector<2x64x256xf32>
    %14 = vector.shape_cast %12 : vector<2x64xf32> to vector<2x64x1xf32>
    %15 = vector.broadcast %14 : vector<2x64x1xf32> to vector<2x64x256xf32>
    %16 = arith.mulf %13, %15 : vector<2x64x256xf32>
    %c0_13 = arith.constant 0 : index
    %c0_14 = arith.constant 0 : index
    %c0_15 = arith.constant 0 : index
    %17 = vector.load %arg4[%c0_13, %c0_14, %c0_15] : memref<2x64x256xf32, #tpu.memory_space<vmem>>, vector<2x64x256xf32>
    tpu.vector_store %arg4[%c0_13, %c0_14, %c0_15], %16 {strides = array<i32>} : memref<2x64x256xf32, #tpu.memory_space<vmem>>, vector<2x64x256xf32>,
    return
  }
  func.func @transform_0(%arg0: i32) -> (i32, i32, i32) {
    %c0_i32 = arith.constant 0 : i32
    %c0_i32_0 = arith.constant 0 : i32
    %c0_i32_1 = arith.constant 0 : i32
    return %arg0, %c0_i32, %c0_i32_0 : i32, i32, i32
  }
  func.func @transform_1(%arg0: i32) -> (i32, i32) {
    %c0_i32 = arith.constant 0 : i32
    %c0_i32_0 = arith.constant 0 : i32
    %c0_i32_1 = arith.constant 0 : i32
    return %c0_i32, %c0_i32_0 : i32, i32
  }
  func.func @transform_2(%arg0: i32) -> (i32, i32) {
    %c0_i32 = arith.constant 0 : i32
    %c0_i32_0 = arith.constant 0 : i32
    %c0_i32_1 = arith.constant 0 : i32
    return %c0_i32, %c0_i32_0 : i32, i32
  }
  func.func @transform_3(%arg0: i32) -> (i32, i32, i32) {
    %c0_i32 = arith.constant 0 : i32
    %c0_i32_0 = arith.constant 0 : i32
    %c0_i32_1 = arith.constant 0 : i32
    return %arg0, %c0_i32, %c0_i32_0 : i32, i32, i32
  }
}

</mosaic_0001>

<bundles_post_ra>
// kernel: tpu_custom_call.1
= control target key start
LH: loop header
LB: loop body
LE: loop exit
PB: predicated region body
PF: predicated region fallthrough
CT: control target
= control target key end

     0   :  { %8 = vsyncpa [#allocation3], 0  ;;  %s1431_s0 = inlined_call_operand.hbm [shape: f32[4,64,256], index: 0, kind: input, shape index: {}]   ;;  %s1432_s1 = inlined_call_operand.vmem [shape: f32[64,4], index: 1, kind: input, shape index: {}]   ;;  %s1433_s2 = inlined_call_operand.vmem [shape: f32[4,64], index: 2, kind: input, shape index: {}]   ;;  %s1434_s3 = inlined_call_operand.hbm [shape: f32[4,64,256], index: 3, kind: output, shape index: {}]  }
   0x1   :  { %10 = vsyncpa [#allocation3 + $0x1], 0 }
   0x2   :  { %11 = vsyncpa [#allocation4], 0 }
   0x3   :  { %13 = vsyncpa [#allocation4 + $0x1], 0  ;;  %s1025_s12 = smov 0   ;;  %s1027_s13 = smov 0  }
   0x4   :  { %s1029_s14 = smov 0   ;;  %s1031_s15 = smov 0  }
   0x5 LB: > { %s1046_s16 = sadd.s32 4294967295, %s995_s15   ;;  %s788_s17 = sadd.s32 4294967294, %s995_s15   ;;  %s995_s15 = sphi %s1031_s15, %s1470_s15   ;;  %s991_s14 = sphi %s1029_s14, %s1469_s14   ;;  %s987_s13 = sphi %s1027_s13, %s1468_s13   ;;  %s983_s12 = sphi %s1025_s12, %s1467_s12  }
   0x6   : > { %s1050_s18 = sadd.s32 1, %s995_s15   ;;  %s26_s19 = sadd.s32 1, %s991_s14 }
   0x7   : > { %s23_s20 = ssub.s32 %s995_s15, %s1050_s18  ;;  %p33_p0 = scmp.ne.s32.totalorder %s991_s14, %s987_s13 }
   0x8   : > { %p24_p1 = scmp.eq.s32.totalorder %s23_s20, 0  ;;  %p34_p2 = scmp.eq.s32.totalorder %s995_s15, 0 }
   0x9   : > { %p39_p3 = scmp.ne.s32.totalorder %s987_s13, %s983_s12  ;;  %p40_p4 = scmp.eq.s32.totalorder %s1046_s16, 0 }
   0xa   : > { %s1062_s21 = scalar_select %p24_p1, %s991_s14, %s26_s19  }
   0xb   : > { %p1064_p5 = por %p34_p2, %p33_p0  ;;  %p1068_p6 = por %p40_p4, %p39_p3 }
   0xc   : > { %p105_p7 = scmp.eq.s32.totalorder %s1046_s16, 1  ;;  %p111_p8 = scmp.eq.s32.totalorder %s788_s17, 1 }
   0xd   : > { %s1445_s23 = scalar_select %p1068_p6, 1, 0 }
   0xe   : > { %p859_p10 = scmp.lt.s32.totalorder %s995_s15, 2  ;;  %p1075_p11 = por %p105_p7, %p33_p0 }
   0xf   : > { %p1079_p12 = por %p111_p8, %p39_p3  ;;  %s137_s26 = sand.u32 1, %s991_s14  }
  0x10   : > { %s1446_s24 = scalar_select %p1075_p11, 1, 0 }
  0x11   : > { %s1447_s25 = scalar_select %p1079_p12, 1, 0 }
  0x12   : > { %s809_s27 = sshll.u32 %s995_s15, 12  ;;  %s791_s28 = sshll.u32 %s137_s26, 8 }
  0x13   : > { %s1088_s4 = scalar_lea.hbm %s1431_s0, %s809_s27  ;;  %s141_s5 = scalar_lea.vmem [#allocation2], %s791_s28 }
  0x14   : > { %s149_s6 = sshll.u32 %s141_s5, 4  ;;  %p1092_p13 = pnand %p859_p10, %p1064_p5  ;;  %s1096_s6 = int_to_ptr.vmem [resolvable:$true] %s149_s6 }
  0x15   : > { %s1098_s8 = scalar_lea.sflag [#allocation3], %s137_s26  ;;  %s903_s9 = scalar_lea.hbm %s1088_s4, 4096 }
  0x16   : > { %p904_p0 = scmp.ne.s32.totalorder %s1088_s4, %s903_s9  ;;  %p905_p1 = pneg %p1092_p13 }
  0x17   : > { %s908_s17 = scalar_lea.hbm %s1431_s0, 8192  ;;  %p909_p4 = scmp.lt.s32.totalorder %s1088_s4, %s1431_s0 }
  0x18   : > { %p906_p2 = pnand %p905_p1, %p904_p0  ;;  %p910_p5 = scmp.lt.s32.totalorder %s908_s17, %s903_s9 }
  0x1a   : > { %p907_p3 = pneg %p906_p2  ;;  %p911_p7 = por %p910_p5, %p909_p4 }
  0x1c   : > { %p912_p8 = pnand %p911_p7, %p907_p3 }
  0x1e   : > { %915 = shalt.err (!%p912_p8)
}
  0x1f   : > { %s916_s22 = scalar_lea.vmem %s1096_s6, 4096  ;;  %s997_s26 = smov [#allocation2]  }
  0x20   : > { %p917_p10 = scmp.ne.s32.totalorder %s1096_s6, %s916_s22  ;;  %s921_s27 = sshll.u32 %s997_s26, 4  ;;  %s922_s27 = int_to_ptr.vmem [resolvable:$false] %s921_s27 }
  0x21   : > { %s923_s28 = scalar_lea.vmem %s922_s27, 8192  ;;  %p924_p2 = scmp.lt.s32.totalorder %s1096_s6, %s922_s27 }
  0x22   : > { %p919_p9 = pnand %p917_p10, %p905_p1  ;;  %p925_p12 = scmp.lt.s32.totalorder %s923_s28, %s916_s22 }
  0x24   : > { %p920_p0 = pneg %p919_p9  ;;  %p926_p11 = por %p925_p12, %p924_p2 }
  0x26   : > { %p927_p6 = pnand %p926_p11, %p920_p0 }
  0x28   : > { %930 = shalt.err (!%p927_p6)
}
  0x29   : > { %s998_s29 = smov 256   ;;  %s999_s30 = smov 16  }
  0x2a   : > { %854 = dma.hbm_to_vmem [thread:$0]  (!%p1092_p13), %s1088_s4, 4096, %s1096_s6, %s1098_s8, %s998_s29, %s998_s29, %s999_s30  }
  0x2b   : > { %p795_p9 = scmp.ge.s32.totalorder %s995_s15, 1  ;;  %p157_p1 = scmp.lt.s32.totalorder %s995_s15, 3 }
  0x2d   : > { %p158_p3 = pnand %p795_p9, %p157_p1 }
  0x2f   : > { %161 = sbr.rel (%p158_p3) target bundleno = 815 (0x32f), region = 32 }
  0x34   : > { %s1122_s5 = sand.u32 1, %s987_s13   ;;  %p1449_p6 = scmp.ne.s32.totalorder %s1445_s23, 0 }
  0x35   : > { %s796_s9 = sshll.u32 %s1122_s5, 8  ;;  %s164_s10 = scalar_lea.sflag [#allocation3], %s1122_s5 }
  0x36   : > { %s1128_s11 = scalar_lea.vmem [#allocation2], %s796_s9 }
  0x37   : > { %974 = dma.done.wait (%p1449_p6), %s164_s10, 4096  }
  0x38   : > { %976 = vsyncadd (%p1449_p6), %s164_s10, 4294963200  ;;  %v1135_v0 = vld [vmem:[%s1128_s11 + $0x80] sm:$0xff]  ;;  %v1138_v1 = vld [vmem:[%s1128_s11 + $0x88] sm:$0xff]  ;;  %v1000_v48 = vmov 0.0   ;;  %vm1001_vm0 = vmmov 0   ;;  %v312_v61 = vlaneseq  ;;  %vm323_vm1 = vcmask 130112  }
  0x39   : > { %v1141_v2 = vld [vmem:[%s1128_s11] sm:$0xff]  ;;  %v248_v3 = vadd.f32 %v1138_v1, %v1135_v0  ;;  %v1146_v4 = vld [vmem:[%s1128_s11 + $0x8] sm:$0xff]  ;;  %v1149_v5 = vld [vmem:[%s1128_s11 + $0x90] sm:$0xff]  ;;  %823 = vmatprep.subr.mxu0 %v1000_v48  ;;  %842 = vmatprep.subr.mxu1 %v1000_v48  ;;  %vm330_vm2 = vcmask 195712   ;;  %vm337_vm3 = vcmask 261312   ;;  %vm344_vm4 = vcmask 326912  }
  0x3a   : > { %v1152_v6 = vld [vmem:[%s1128_s11 + $0x98] sm:$0xff]  ;;  %v224_v7 = vadd.f32 %v1146_v4, %v1141_v2  ;;  %v1157_v8 = vld [vmem:[%s1128_s11 + $0x10] sm:$0xff]  ;;  %v1167_v12 = vld [vmem:[%s1128_s11 + $0xa0] sm:$0xff]  ;;  %839 = vmatprep.mubr.msk.f32.mxu0 %vm1001_vm0, %v1000_v48  ;;  %844 = vmatprep.mubr.msk.f32.mxu1 %vm1001_vm0, %v1000_v48  ;;  %vm351_vm5 = vcmask 392512   ;;  %vm358_vm6 = vcmask 458112   ;;  %vm365_vm7 = vcmask 523712  }
  0x3b   : > { %v1160_v9 = vld [vmem:[%s1128_s11 + $0x18] sm:$0xff]  ;;  %249 = vadd.xlane.f32.xlu1 %v248_v3  ;;  %v251_v10 = vadd.f32 %v1152_v6, %v1149_v5  ;;  %v1170_v13 = vld [vmem:[%s1128_s11 + $0xa8] sm:$0xff]  ;;  %v1173_v14 = vld [vmem:[%s1128_s11 + $0x20] sm:$0xff]  ;;  %v313_v3 = vand.u32 127, %v312_v61  ;;  %vm406_vm8 = vcmask 1041409   ;;  %vm408_vm9 = vcmask 523264  }
  0x3c   : > { %225 = vadd.xlane.f32.xlu0 %v224_v7  ;;  %v227_v11 = vadd.f32 %v1160_v9, %v1157_v8  ;;  %v1176_v15 = vld [vmem:[%s1128_s11 + $0x28] sm:$0xff]  ;;  %v254_v16 = vadd.f32 %v1170_v13, %v1167_v12  ;;  %v1183_v18 = vld [vmem:[%s1128_s11 + $0xb0] sm:$0xff]  ;;  %v1186_v19 = vld [vmem:[%s1128_s11 + $0xb8] sm:$0xff]  ;;  %vm486_vm10 = vcmask 1043456   ;;  %vm482_vm11 = vcmask 31744   ;;  %s1319_s6 = scalar_lea.vmem [#allocation5], %s796_s9 }
  0x3d   : > { %v230_v17 = vadd.f32 %v1176_v15, %v1173_v14  ;;  %1450 = vst [vmem:[#allocation8_spill] sm:$0xff] %v1186_v19  ;;  %v1189_v20 = vld [vmem:[%s1128_s11 + $0x30] sm:$0xff]  ;;  %v1192_v21 = vld [vmem:[%s1128_s11 + $0x38] sm:$0xff]  ;;  %v257_v22 = vadd.f32 %v1186_v19, %v1183_v18  ;;  %v1199_v24 = vld [vmem:[%s1128_s11 + $0xc0] sm:$0xff]  ;;  %s811_s9 = sshll.u32 %s1046_s16, 12  ;;  %s715_s7 = sshll.u32 %s1319_s6, 4  ;;  %s1384_s7 = int_to_ptr.vmem [resolvable:$true] %s715_s7 }
  0x3e   : > { %v233_v23 = vadd.f32 %v1192_v21, %v1189_v20  ;;  %v1202_v25 = vld [vmem:[%s1128_s11 + $0xc8] sm:$0xff]  ;;  %v1205_v26 = vld [vmem:[%s1128_s11 + $0x40] sm:$0xff]  ;;  %v1215_v30 = vld [vmem:[%s1128_s11 + $0xd0] sm:$0xff]  ;;  %s1382_s19 = scalar_lea.hbm %s1434_s3, %s811_s9  ;;  %s701_s16 = scalar_lea.sflag [#allocation4], %s1122_s5 }
  0x3f   : > { %252 = vadd.xlane.f32.xlu1 %v251_v10  ;;  %v1208_v27 = vld [vmem:[%s1128_s11 + $0x48] sm:$0xff]  ;;  %v260_v28 = vadd.f32 %v1202_v25, %v1199_v24  ;;  %1451 = vst [vmem:[#allocation9_spill] sm:$0xff] %v1215_v30  ;;  %v1218_v31 = vld [vmem:[%s1128_s11 + $0xd8] sm:$0xff]  ;;  %v1221_v32 = vld [vmem:[%s1128_s11 + $0x50] sm:$0xff]  ;;  %v1286_v10 = vshrl.u32 %v312_v61, 7  ;;  %s931_s20 = scalar_lea.vmem %s1384_s7, 4096 }
  0x40   : > { %228 = vadd.xlane.f32.xlu0 %v227_v11  ;;  %v236_v29 = vadd.f32 %v1208_v27, %v1205_v26  ;;  %1452 = vst [vmem:[#allocation10_spill] sm:$0xff] %v1218_v31  ;;  %v1224_v33 = vld [vmem:[%s1128_s11 + $0x58] sm:$0xff]  ;;  %v263_v34 = vadd.f32 %v1218_v31, %v1215_v30  ;;  %v1231_v36 = vld [vmem:[%s1128_s11 + $0xe0] sm:$0xff]  ;;  %v1234_v37 = vld [vmem:[%s1128_s11 + $0xe8] sm:$0xff]  ;;  %p932_p11 = scmp.ne.s32.totalorder %s1384_s7, %s931_s20  ;;  %p1464_p12 = scmp.ne.s32.totalorder %s1446_s24, 0 }
  0x41   : > { %v239_v35 = vadd.f32 %v1224_v33, %v1221_v32  ;;  %1453 = vst [vmem:[#allocation11_spill] sm:$0xff] %v1231_v36  ;;  %1454 = vst [vmem:[#allocation12_spill] sm:$0xff] %v1234_v37  ;;  %v1237_v38 = vld [vmem:[%s1128_s11 + $0x60] sm:$0xff]  ;;  %v1240_v39 = vld [vmem:[%s1128_s11 + $0x68] sm:$0xff]  ;;  %v266_v40 = vadd.f32 %v1234_v37, %v1231_v36  ;;  %s1002_s22 = smov [#allocation5]  }
  0x42   : > { %v242_v41 = vadd.f32 %v1240_v39, %v1237_v38  ;;  %v1247_v42 = vld [vmem:[%s1128_s11 + $0xf0] sm:$0xff]  ;;  %v1250_v43 = vld [vmem:[%s1128_s11 + $0xf8] sm:$0xff]  ;;  %v293_v51 = vld [vmem:[%s1432_s1 + $0x28] sm:$0xff]  ;;  %p933_p13 = pnand %p932_p11, %p1464_p12  ;;  %s935_s26 = sshll.u32 %s1002_s22, 4  ;;  %s936_s26 = int_to_ptr.vmem [resolvable:$false] %s935_s26 }
  0x43   : > { %255 = vadd.xlane.f32.xlu1 %v254_v16  ;;  %1455 = vst [vmem:[#allocation13_spill] sm:$0xff] %v1247_v42  ;;  %1456 = vst [vmem:[#allocation14_spill] sm:$0xff] %v1250_v43  ;;  %v1253_v44 = vld [vmem:[%s1128_s11 + $0x70] sm:$0xff]  ;;  %v1256_v45 = vld [vmem:[%s1128_s11 + $0x78] sm:$0xff]  ;;  %v269_v46 = vadd.f32 %v1250_v43, %v1247_v42  ;;  %v318_v16 = vadd.s32 4294967288, %v313_v3  ;;  %s937_s27 = scalar_lea.vmem %s936_s26, 8192  ;;  %p938_p5 = scmp.lt.s32.totalorder %s1384_s7, %s936_s26 }
  0x44   : > { %231 = vadd.xlane.f32.xlu0 %v230_v17  ;;  %v245_v47 = vadd.f32 %v1256_v45, %v1253_v44  ;;  %v295_v49 = vld [vmem:[%s1432_s1 + $0x38] sm:$0xff]  ;;  %v294_v50 = vld [vmem:[%s1432_s1 + $0x30] sm:$0xff]  ;;  %v292_v52 = vld [vmem:[%s1432_s1 + $0x20] sm:$0xff]  ;;  %v325_v17 = vadd.s32 4294967280, %v313_v3  ;;  %p934_p4 = pneg %p933_p13  ;;  %p939_p7 = scmp.lt.s32.totalorder %s937_s27, %s931_s20 }
  0x45   : > { %824 = vmatpush3.msra.mxu0 %v295_v49  ;;  %v291_v53 = vld [vmem:[%s1432_s1 + $0x18] sm:$0xff]  ;;  %v290_v54 = vld [vmem:[%s1432_s1 + $0x10] sm:$0xff]  ;;  %v289_v55 = vld [vmem:[%s1432_s1 + $0x8] sm:$0xff] }
  0x46   : > { %825 = vmatprep.subr.mxu0 %v1000_v48  ;;  %v288_v56 = vld [vmem:[%s1432_s1] sm:$0xff]  ;;  %p940_p8 = por %p939_p7, %p938_p5 }
  0x47   : > { %258 = vadd.xlane.f32.xlu1 %v257_v22  ;;  %826 = vmatpush3.msra.mxu0 %v294_v50  ;;  %v332_v22 = vadd.s32 4294967272, %v313_v3 }
  0x48   : > { %234 = vadd.xlane.f32.xlu0 %v233_v23  ;;  %827 = vmatprep.subr.mxu0 %v1000_v48  ;;  %v339_v23 = vadd.s32 4294967264, %v313_v3  ;;  %p941_p10 = pnand %p940_p8, %p934_p4 }
  0x49   : > { %828 = vmatpush3.msra.mxu0 %v293_v51 }
  0x4a   : > { %829 = vmatprep.subr.mxu0 %v1000_v48  ;;  %v342_v49 = vsub.s32 %v339_v23, %v1286_v10  ;;  %v360_v23 = vadd.s32 4294967240, %v313_v3 }
  0x4b   : > { %261 = vadd.xlane.f32.xlu1 %v260_v28  ;;  %830 = vmatpush3.msra.mxu0 %v292_v52 }
  0x4c   : > { %237 = vadd.xlane.f32.xlu0 %v236_v29  ;;  %831 = vmatprep.subr.mxu0 %v1000_v48  ;;  %v346_v29 = vadd.s32 4294967256, %v313_v3 }
  0x4d   : > { %832 = vmatpush3.msra.mxu0 %v291_v53 }
  0x4e   : > { %833 = vmatprep.subr.mxu0 %v1000_v48  ;;  %v349_v52 = vsub.s32 %v346_v29, %v1286_v10 }
  0x4f   : > { %264 = vadd.xlane.f32.xlu1 %v263_v34  ;;  %834 = vmatpush3.msra.mxu0 %v290_v54  ;;  %v316_v34 = vsub.s32 %v313_v3, %v1286_v10 }
  0x50   : > { %240 = vadd.xlane.f32.xlu0 %v239_v35  ;;  %835 = vmatprep.subr.mxu0 %v1000_v48 }
  0x51   : > { %836 = vmatpush3.msra.mxu0 %v289_v55 }
  0x52   : > { %837 = vmatprep.subr.mxu0 %v1000_v48  ;;  %v335_v48 = vsub.s32 %v332_v22, %v1286_v10 }
  0x53   : > { %267 = vadd.xlane.f32.xlu1 %v266_v40  ;;  %838 = vmatpush3.msra.mxu0 %v288_v56  ;;  %v321_v40 = vsub.s32 %v318_v16, %v1286_v10 }
  0x54   : > { %243 = vadd.xlane.f32.xlu0 %v242_v41  ;;  %v328_v41 = vsub.s32 %v325_v17, %v1286_v10 }
  0x57   : > { %270 = vadd.xlane.f32.xlu1 %v269_v46  ;;  %v353_v46 = vadd.s32 4294967248, %v313_v3  ;;  %v363_v3 = vsub.s32 %v360_v23, %v1286_v10 }
  0x58   : > { %246 = vadd.xlane.f32.xlu0 %v245_v47 }
  0xc4   : > { %v250_v57 = vpop.xlane.xlu1 %249 }
  0xc5   : > { %v226_v58 = vpop.xlane.xlu0 %225  ;;  %v280_v54 = vmul.f32 0.00390625, %v250_v57 }
  0xc6   : > { %v272_v16 = vmul.f32 0.00390625, %v226_v58 }
  0xc7   : > { %v370_v37 = vrot.slane %v280_v54, %v316_v34 }
  0xc8   : > { %v253_v59 = vpop.xlane.xlu1 %252  ;;  %v317_v19 = vrot.slane %v272_v16, %v316_v34 }
  0xc9   : > { %v229_v60 = vpop.xlane.xlu0 %228  ;;  %v281_v47 = vmul.f32 0.00390625, %v253_v59  ;;  %v356_v59 = vsub.s32 %v353_v46, %v1286_v10 }
  0xca   : > { %v273_v50 = vmul.f32 0.00390625, %v229_v60 }
  0xcb   : > { %v374_v22 = vrot.slane %v281_v47, %v321_v40 }
  0xcc   : > { %v256_v62 = vpop.xlane.xlu1 %255  ;;  %v322_v60 = vrot.slane %v273_v50, %v321_v40 }
  0xcd   : > { %v232_v63 = vpop.xlane.xlu0 %231  ;;  %v282_v51 = vmul.f32 0.00390625, %v256_v62  ;;  %v375_v46 = vsel %vm323_vm1, %v374_v22, %v370_v37  ;;  %v481_v22 = vld [vmem:[%s1433_s2] sm:$0xf] }
  0xce   : > { %v274_v55 = vmul.f32 0.00390625, %v232_v63  ;;  %v324_v40 = vsel %vm323_vm1, %v322_v60, %v317_v19  ;;  %843 = vmatpush3.msk.msra.mxu1 %vm486_vm10, %v481_v22  ;;  %v1462_v22 = vld [vmem:[#allocation13_spill] sm:$0xff] }
  0xcf   : > { %v379_v62 = vrot.slane %v282_v51, %v328_v41 }
  0xd0   : > { %v259_v7 = vpop.xlane.xlu1 %258  ;;  %v329_v57 = vrot.slane %v274_v55, %v328_v41 }
  0xd1   : > { %v235_v11 = vpop.xlane.xlu0 %234  ;;  %v283_v56 = vmul.f32 0.00390625, %v259_v7  ;;  %v380_v50 = vsel %vm330_vm2, %v379_v62, %v375_v46  ;;  %v603_v46 = vsub.s32 1, %v1286_v10 }
  0xd2   : > { %v275_v17 = vmul.f32 0.00390625, %v235_v11  ;;  %v331_v54 = vsel %vm330_vm2, %v329_v57, %v324_v40 }
  0xd3   : > { %v384_v63 = vrot.slane %v283_v56, %v335_v48 }
  0xd4   : > { %v262_v28 = vpop.xlane.xlu1 %261  ;;  %v336_v58 = vrot.slane %v275_v17, %v335_v48 }
  0xd5   : > { %v238_v35 = vpop.xlane.xlu0 %237  ;;  %v284_v43 = vmul.f32 0.00390625, %v262_v28  ;;  %v385_v34 = vsel %vm337_vm3, %v384_v63, %v380_v50 }
  0xd6   : > { %v276_v42 = vmul.f32 0.00390625, %v238_v35  ;;  %v338_v37 = vsel %vm337_vm3, %v336_v58, %v331_v54  ;;  %v568_v58 = vsub.s32 0, %v1286_v10 }
  0xd7   : > { %v389_v11 = vrot.slane %v284_v43, %v342_v49 }
  0xd8   : > { %v265_v53 = vpop.xlane.xlu1 %264  ;;  %v343_v47 = vrot.slane %v276_v42, %v342_v49 }
  0xd9   : > { %v241_v61 = vpop.xlane.xlu0 %240  ;;  %v285_v31 = vmul.f32 0.00390625, %v265_v53 }
  0xda   : > { %v277_v30 = vmul.f32 0.00390625, %v241_v61  ;;  %v345_v19 = vsel %vm344_vm4, %v343_v47, %v338_v37 }
  0xdb   : > { %v394_v35 = vrot.slane %v285_v31, %v349_v52  ;;  %v390_v31 = vsel %vm344_vm4, %v389_v11, %v385_v34 }
  0xdc   : > { %v268_v29 = vpop.xlane.xlu1 %267  ;;  %v350_v51 = vrot.slane %v277_v30, %v349_v52 }
  0xdd   : > { %v286_v7 = vmul.f32 0.00390625, %v268_v29  ;;  %v244_v36 = vpop.xlane.xlu0 %243  ;;  %v395_v49 = vsel %vm351_vm5, %v394_v35, %v390_v31 }
  0xde   : > { %v278_v28 = vmul.f32 0.00390625, %v244_v36  ;;  %v352_v52 = vsel %vm351_vm5, %v350_v51, %v345_v19 }
  0xdf   : > { %v399_v53 = vrot.slane %v286_v7, %v356_v59 }
  0xe0   : > { %v271_v41 = vpop.xlane.xlu1 %270  ;;  %v357_v48 = vrot.slane %v278_v28, %v356_v59 }
  0xe1   : > { %v287_v43 = vmul.f32 0.00390625, %v271_v41  ;;  %v247_v36 = vpop.xlane.xlu0 %246  ;;  %v400_v55 = vsel %vm358_vm6, %v399_v53, %v395_v49 }
  0xe2   : > { %v279_v42 = vmul.f32 0.00390625, %v247_v36  ;;  %v359_v61 = vsel %vm358_vm6, %v357_v48, %v352_v52 }
  0xe3   : > { %v404_v30 = vrot.slane %v287_v43, %v363_v3 }
  0xe4   : > { %v364_v56 = vrot.slane %v279_v42, %v363_v3 }
  0xe5   : > { %v405_v16 = vsel %vm365_vm7, %v404_v30, %v400_v55  ;;  %v1457_v30 = vld [vmem:[#allocation8_spill] sm:$0xff] }
  0xe6   : > { %v366_v17 = vsel %vm365_vm7, %v364_v56, %v359_v61  ;;  %v1459_v56 = vld [vmem:[#allocation12_spill] sm:$0xff]  ;;  %v1460_v61 = vld [vmem:[#allocation9_spill] sm:$0xff] }
  0xe7   : > { %v407_v59 = vsel %vm406_vm8, %v405_v16, %v366_v17  ;;  %v1461_v17 = vld [vmem:[#allocation10_spill] sm:$0xff] }
  0xe8   : > { %840 = vmatmul.mubr.msk.f32.vlgmr.msra.gmra.mxu0 %vm408_vm9, %v407_v59 }
 0x1a8   : > { %v477_v23 = vpop.f32.mrf.mxu0 }
 0x1a9   : > { %845 = vmatmul.mubr.msk.f32.vlgmr.msra.gmra.mxu1 %vm482_vm11, %v477_v23 }
 0x1aa   : > { %v841_v60 = vpop.f32.mrf.mxu0 }
 0x1ab   : > { %v1463_v60 = vld [vmem:[#allocation14_spill] sm:$0xff] }
 0x269   : > { %v556_v62 = vpop.f32.mrf.mxu1 }
 0x26a   : > { %v801_v29 = vmul.f32 -1.442695, %v556_v62 }
 0x26b   : > { %v846_v57 = vpop.f32.mrf.mxu1 }
 0x26c   : > { %899 = vpow2.f32 %v801_v29 }
 0x279   : > { %v900_v63 = vpop.eup %899 }
 0x27a   : > { %v563_v7 = vadd.f32 1.0, %v900_v63 }
 0x27c   : > { %901 = vrcp.f32 %v563_v7 }
 0x289   : > { %v902_v11 = vpop.eup %901 }
 0x28a   : > { %v569_v28 = vrot.slane %v902_v11, %v568_v58  ;;  %v604_v47 = vrot.slane %v902_v11, %v603_v46 }
 0x28c   : > { %575 = vbcast.lane.b32.xlu1 %v569_v28, 264  ;;  %571 = vbcast.lane.b32.xlu0 %v569_v28, 256 }
 0x290   : > { %579 = vbcast.lane.b32.xlu1 %v569_v28, 272  ;;  %587 = vbcast.lane.b32.xlu0 %v569_v28, 288 }
 0x294   : > { %583 = vbcast.lane.b32.xlu1 %v569_v28, 280  ;;  %595 = vbcast.lane.b32.xlu0 %v569_v28, 304 }
 0x298   : > { %591 = vbcast.lane.b32.xlu1 %v569_v28, 296  ;;  %606 = vbcast.lane.b32.xlu0 %v604_v47, 256 }
 0x29c   : > { %599 = vbcast.lane.b32.xlu1 %v569_v28, 312  ;;  %614 = vbcast.lane.b32.xlu0 %v604_v47, 272 }
 0x2a0   : > { %610 = vbcast.lane.b32.xlu1 %v604_v47, 264  ;;  %622 = vbcast.lane.b32.xlu0 %v604_v47, 288 }
 0x2a4   : > { %618 = vbcast.lane.b32.xlu1 %v604_v47, 280  ;;  %630 = vbcast.lane.b32.xlu0 %v604_v47, 304 }
 0x2a8   : > { %626 = vbcast.lane.b32.xlu1 %v604_v47, 296 }
 0x2ac   : > { %634 = vbcast.lane.b32.xlu1 %v604_v47, 312 }
 0x2fe   : > { %v576_v35 = vpop.permute.xlu1 %575  ;;  %v572_v3 = vpop.permute.xlu0 %571 }
 0x2ff   : > { %v638_v40 = vmul.f32 %v576_v35, %v1157_v8  ;;  %v639_v10 = vmul.f32 %v576_v35, %v1160_v9  ;;  %v636_v50 = vmul.f32 %v572_v3, %v1141_v2  ;;  %v637_v51 = vmul.f32 %v572_v3, %v1146_v4 }
 0x301   : > { %670 = vst [vmem:[%s1319_s6 + $0x10] sm:$0xff] %v638_v40  ;;  %671 = vst [vmem:[%s1319_s6 + $0x18] sm:$0xff] %v639_v10 }
 0x302   : > { %668 = vst [vmem:[%s1319_s6] sm:$0xff] %v636_v50  ;;  %669 = vst [vmem:[%s1319_s6 + $0x8] sm:$0xff] %v637_v51  ;;  %v580_v8 = vpop.permute.xlu1 %579  ;;  %v588_v2 = vpop.permute.xlu0 %587 }
 0x303   : > { %v640_v4 = vmul.f32 %v580_v8, %v1173_v14  ;;  %v641_v9 = vmul.f32 %v580_v8, %v1176_v15  ;;  %v644_v53 = vmul.f32 %v588_v2, %v1205_v26  ;;  %v645_v41 = vmul.f32 %v588_v2, %v1208_v27 }
 0x305   : > { %672 = vst [vmem:[%s1319_s6 + $0x20] sm:$0xff] %v640_v4  ;;  %673 = vst [vmem:[%s1319_s6 + $0x28] sm:$0xff] %v641_v9 }
 0x306   : > { %676 = vst [vmem:[%s1319_s6 + $0x40] sm:$0xff] %v644_v53  ;;  %677 = vst [vmem:[%s1319_s6 + $0x48] sm:$0xff] %v645_v41  ;;  %v584_v54 = vpop.permute.xlu1 %583  ;;  %v596_v34 = vpop.permute.xlu0 %595 }
 0x307   : > { %v642_v48 = vmul.f32 %v584_v54, %v1189_v20  ;;  %v643_v14 = vmul.f32 %v584_v54, %v1192_v21  ;;  %v648_v15 = vmul.f32 %v596_v34, %v1237_v38  ;;  %v649_v26 = vmul.f32 %v596_v34, %v1240_v39 }
 0x309   : > { %674 = vst [vmem:[%s1319_s6 + $0x30] sm:$0xff] %v642_v48  ;;  %675 = vst [vmem:[%s1319_s6 + $0x38] sm:$0xff] %v643_v14 }
 0x30a   : > { %680 = vst [vmem:[%s1319_s6 + $0x60] sm:$0xff] %v648_v15  ;;  %681 = vst [vmem:[%s1319_s6 + $0x68] sm:$0xff] %v649_v26  ;;  %v592_v27 = vpop.permute.xlu1 %591  ;;  %v607_v43 = vpop.permute.xlu0 %606 }
 0x30b   : > { %v646_v36 = vmul.f32 %v592_v27, %v1221_v32  ;;  %v647_v20 = vmul.f32 %v592_v27, %v1224_v33  ;;  %v652_v21 = vmul.f32 %v607_v43, %v1135_v0  ;;  %v653_v38 = vmul.f32 %v607_v43, %v1138_v1 }
 0x30d   : > { %678 = vst [vmem:[%s1319_s6 + $0x50] sm:$0xff] %v646_v36  ;;  %679 = vst [vmem:[%s1319_s6 + $0x58] sm:$0xff] %v647_v20 }
 0x30e   : > { %684 = vst [vmem:[%s1319_s6 + $0x80] sm:$0xff] %v652_v21  ;;  %685 = vst [vmem:[%s1319_s6 + $0x88] sm:$0xff] %v653_v38  ;;  %v600_v39 = vpop.permute.xlu1 %599  ;;  %v615_v37 = vpop.permute.xlu0 %614 }
 0x30f   : > { %v650_v31 = vmul.f32 %v600_v39, %v1253_v44  ;;  %v651_v32 = vmul.f32 %v600_v39, %v1256_v45  ;;  %v656_v33 = vmul.f32 %v615_v37, %v1167_v12  ;;  %v657_v0 = vmul.f32 %v615_v37, %v1170_v13 }
 0x311   : > { %682 = vst [vmem:[%s1319_s6 + $0x70] sm:$0xff] %v650_v31  ;;  %683 = vst [vmem:[%s1319_s6 + $0x78] sm:$0xff] %v651_v32 }
 0x312   : > { %688 = vst [vmem:[%s1319_s6 + $0xa0] sm:$0xff] %v656_v33  ;;  %689 = vst [vmem:[%s1319_s6 + $0xa8] sm:$0xff] %v657_v0  ;;  %v611_v1 = vpop.permute.xlu1 %610  ;;  %v623_v42 = vpop.permute.xlu0 %622 }
 0x313   : > { %v654_v19 = vmul.f32 %v611_v1, %v1149_v5  ;;  %v655_v44 = vmul.f32 %v611_v1, %v1152_v6  ;;  %v660_v45 = vmul.f32 %v623_v42, %v1199_v24  ;;  %v661_v12 = vmul.f32 %v623_v42, %v1202_v25  ;;  %v1458_v6 = vld [vmem:[#allocation11_spill] sm:$0xff] }
 0x315   : > { %686 = vst [vmem:[%s1319_s6 + $0x90] sm:$0xff] %v654_v19  ;;  %687 = vst [vmem:[%s1319_s6 + $0x98] sm:$0xff] %v655_v44 }
 0x316   : > { %692 = vst [vmem:[%s1319_s6 + $0xc0] sm:$0xff] %v660_v45  ;;  %693 = vst [vmem:[%s1319_s6 + $0xc8] sm:$0xff] %v661_v12  ;;  %v619_v13 = vpop.permute.xlu1 %618  ;;  %v631_v49 = vpop.permute.xlu0 %630 }
 0x317   : > { %v658_v5 = vmul.f32 %v619_v13, %v1183_v18  ;;  %v659_v52 = vmul.f32 %v619_v13, %v1457_v30  ;;  %v664_v55 = vmul.f32 %v631_v49, %v1458_v6  ;;  %v665_v24 = vmul.f32 %v631_v49, %v1459_v56 }
 0x319   : > { %690 = vst [vmem:[%s1319_s6 + $0xb0] sm:$0xff] %v658_v5  ;;  %691 = vst [vmem:[%s1319_s6 + $0xb8] sm:$0xff] %v659_v52 }
 0x31a   : > { %696 = vst [vmem:[%s1319_s6 + $0xe0] sm:$0xff] %v664_v55  ;;  %697 = vst [vmem:[%s1319_s6 + $0xe8] sm:$0xff] %v665_v24  ;;  %v627_v25 = vpop.permute.xlu1 %626 }
 0x31b   : > { %v662_v16 = vmul.f32 %v627_v25, %v1460_v61  ;;  %v663_v59 = vmul.f32 %v627_v25, %v1461_v17 }
 0x31d   : > { %694 = vst [vmem:[%s1319_s6 + $0xd0] sm:$0xff] %v662_v16  ;;  %695 = vst [vmem:[%s1319_s6 + $0xd8] sm:$0xff] %v663_v59 }
 0x31e   : > { %v635_v18 = vpop.permute.xlu1 %634 }
 0x31f   : > { %v666_v23 = vmul.f32 %v635_v18, %v1462_v22  ;;  %v667_v62 = vmul.f32 %v635_v18, %v1463_v60 }
 0x321   : > { %698 = vst [vmem:[%s1319_s6 + $0xf0] sm:$0xff] %v666_v23  ;;  %699 = vst [vmem:[%s1319_s6 + $0xf8] sm:$0xff] %v667_v62 }
 0x322   : > { %944 = shalt.err (!%p941_p10)
}
 0x323   : > { %s945_s28 = scalar_lea.hbm %s1382_s19, 4096  ;;  %s949_s10 = scalar_lea.hbm %s1434_s3, 8192 }
 0x324   : > { %p946_p0 = scmp.ne.s32.totalorder %s1382_s19, %s945_s28  ;;  %p950_p1 = scmp.lt.s32.totalorder %s1382_s19, %s1434_s3 }
 0x325   : > { %p951_p3 = scmp.lt.s32.totalorder %s949_s10, %s945_s28 }
 0x326   : > { %p947_p2 = pnand %p946_p0, %p1464_p12 }
 0x327   : > { %p952_p6 = por %p951_p3, %p950_p1 }
 0x328   : > { %p948_p9 = pneg %p947_p2 }
 0x32a   : > { %p953_p11 = pnand %p952_p6, %p948_p9 }
 0x32c   : > { %956 = shalt.err (!%p953_p11)
}
 0x32d   : > { %s1003_s4 = smov 256   ;;  %s1004_s6 = smov 16  }
 0x32e   : > { %849 = dma.vmem_to_hbm [thread:$0]  (%p1464_p12), %s1384_s7, 4096, %s1382_s19, %s701_s16, %s1003_s4, %s1003_s4, %s1004_s6  }
 0x32f PF: > { %s730_s9 = sand.u32 1, %s983_s12   ;;  %p1465_p13 = scmp.ne.s32.totalorder %s1447_s25, 0 }
 0x330   : > { %p1466_p4 = scmp.ge.s32.totalorder %s995_s15, 2  ;;  %s731_s8 = scalar_lea.sflag [#allocation4], %s730_s9 }
 0x332   : > { %p856_p5 = pnand %p1466_p4, %p1465_p13 }
 0x334   : > { %p857_p7 = pneg %p856_p5 }
 0x336   : > { %978 = dma.done.wait (%p857_p7), %s731_s8, 4096  }
 0x337   : > { %980 = vsyncadd (%p857_p7), %s731_s8, 4294963200  ;;  %p16_p8 = scmp.ge.s32.totalorder %s1050_s18, 4   ;;  %s1467_s12 = smov %s987_s13 }
 0x338   : > { %s1468_s13 = smov %s991_s14  ;;  %s1469_s14 = smov %s1062_s21 }
 0x339   : > { %s1470_s15 = smov %s1050_s18  ;;  %18 = sbr.rel (!%p16_p8) target bundleno = 5 (0x5), region = 77 }
 0x33e   :  { %736 = vsyncpa [#allocation3], 1 }
 0x33f   :  { %738 = vsyncpa [#allocation3 + $0x1], 1 }
 0x340   :  { %739 = vsyncpa [#allocation4], 1 }
 0x341   :  { %741 = vsyncpa [#allocation4 + $0x1], 1 }

</bundles_post_ra>
